<compile_context>
chip_gen: v7x
topology: tpu7x:2x2x1
jax: 0.10.0
libtpu: 0.0.40
codegen_flags: <defaults>
</compile_context>

<pallas_src>
import math

import jax
import jax.numpy as jnp
from jax.experimental import pallas as pl
from jax.experimental.pallas import tpu as pltpu

_LANE = 128
_SUBLANE = 8


def _round_up(x: int, m: int) -> int:
    return ((x + m - 1) // m) * m


def _pad2(a, rows, cols):
    r, c = a.shape
    if r == rows and c == cols:
        return a
    return jnp.pad(a, ((0, rows - r), (0, cols - c)))


def _make_mlp_kernel(n_layers: int):
    """Fused-MLP kernel body.

    Ref order:
      (x_ref, d_ref, w0x, w0d, b0, w1, b1, ..., w_{L-1}, b_{L-1}, out_ref)

    The first Linear's weight is split row-wise into its x0 / d0 halves so the
    torch.cat((x0, d0), dim=1) never materializes in HBM.  Weights are bf16
    (MXU-native on v5e/v6e/v7x); biases, the accumulator and tanh stay f32.
    """

    def kernel(*refs):
        x_ref, d_ref = refs[0], refs[1]
        out_ref = refs[-1]
        p = refs[2:-1]

        w0x, w0d, b0 = p[0], p[1], p[2]
        h = (
            jnp.dot(x_ref[...].astype(w0x.dtype), w0x[...],
                    preferred_element_type=jnp.float32)
            + jnp.dot(d_ref[...].astype(w0d.dtype), w0d[...],
                      preferred_element_type=jnp.float32)
            + b0[...]
        )
        if n_layers > 1:
            h = jnp.tanh(h)
        # TODO(synk): torch.nn.Dropout is a train-time op; this kernel
        # implements eval-mode (identity) semantics.

        idx = 3
        for i in range(1, n_layers):
            w, b = p[idx], p[idx + 1]
            idx += 2
            h = jnp.dot(h.astype(w.dtype), w[...],
                        preferred_element_type=jnp.float32) + b[...]
            if i != n_layers - 1:
                h = jnp.tanh(h)

        out_ref[...] = h.astype(out_ref.dtype)

    return kernel


def vae_encoder_forward(x0, d0, params, *, max_tile_b=128,
                        weight_dtype=jnp.bfloat16):
    """Pallas implementation of VAEEncoder.forward (eval mode).

    Inputs:
        x0:     [batch, n_x] float32
        d0:     [batch, n_d] float32
        params: list of (W [in, out], b [out]) per linear layer;
                layer_arch[0] == n_x + n_d, layer_arch[-1] == 2 * n_z.
    Returns:
        (z0 [batch, n_z], param_f [batch, 2*n_z])  -- as module.eval():
        z0 == mu_f (no sampling).
    """
    batch, n_x = x0.shape
    n_d = d0.shape[1]
    n_layers = len(params)
    out_dim = params[-1][0].shape[1]
    assert out_dim % 2 == 0, "VAEEncoder last layer must emit (mu, logvar)"
    n_z = out_dim // 2
    assert params[0][0].shape[0] == n_x + n_d

    # ---- padded geometry: lane-dense features, sublane-aligned batch tiles ----
    n_x_p = _round_up(n_x, _LANE)
    n_d_p = _round_up(n_d, _LANE)
    dims = [w.shape[1] for (w, _) in params]          # per-layer output sizes
    dims_p = [_round_up(d, _LANE) for d in dims]
    out_p = dims_p[-1]

    tile_b = min(max_tile_b, _round_up(batch, _SUBLANE))
    batch_p = _round_up(batch, tile_b)
    grid = (batch_p // tile_b,)

    # ---- pad & cast parameters (one-time; tiny). Zero padding keeps the math
    #      exact: padded feature columns stay identically zero through tanh. ----
    w0, b0 = params[0]
    w0 = w0.astype(jnp.float32)
    b0 = b0.reshape(1, -1).astype(jnp.float32)
    w0x = _pad2(w0[:n_x], n_x_p, dims_p[0]).astype(weight_dtype)
    w0d = _pad2(w0[n_x:], n_d_p, dims_p[0]).astype(weight_dtype)
    flat_params = [w0x, w0d, _pad2(b0, 1, dims_p[0])]
    prev_p = dims_p[0]
    for li in range(1, n_layers):
        w, b = params[li]
        flat_params.append(
            _pad2(w.astype(jnp.float32), prev_p, dims_p[li]).astype(weight_dtype))
        flat_params.append(
            _pad2(b.reshape(1, -1).astype(jnp.float32), 1, dims_p[li]))
        prev_p = dims_p[li]

    # ---- pad activations (batch to tile multiple, features to lane multiple) ----
    x_p = jnp.pad(x0.astype(jnp.float32),
                  ((0, batch_p - batch), (0, n_x_p - n_x)))
    d_p = jnp.pad(d0.astype(jnp.float32),
                  ((0, batch_p - batch), (0, n_d_p - n_d)))

    # ---- specs: batch-tiled activations, VMEM-resident weights ----
    x_spec = pl.BlockSpec((tile_b, n_x_p), lambda i: (i, 0))
    d_spec = pl.BlockSpec((tile_b, n_d_p), lambda i: (i, 0))
    w_specs = [pl.BlockSpec(p.shape, lambda i: (0, 0)) for p in flat_params]
    out_spec = pl.BlockSpec((tile_b, out_p), lambda i: (i, 0))

    # ---- cost estimate on the padded problem ----
    flops = 2 * batch_p * (n_x_p + n_d_p) * dims_p[0]
    prev_p = dims_p[0]
    for li in range(1, n_layers):
        flops += 2 * batch_p * prev_p * dims_p[li]
        prev_p = dims_p[li]
    transcendentals = batch_p * sum(dims_p[:-1])
    param_bytes = sum(int(p.size) * p.dtype.itemsize for p in flat_params)
    bytes_accessed = (int(x_p.size) + int(d_p.size) + batch_p * out_p) * 4 \
        + param_bytes

    # ---- VMEM budget: double-buffered tiles + resident params + activations,
    #      with headroom, capped at v7x's 64 MiB physical VMEM ----
    act_tile_bytes = tile_b * (n_x_p + n_d_p + out_p) * 4
    interm_bytes = 4 * tile_b * max(dims_p) * 4
    vmem_need = 2 * act_tile_bytes + 2 * param_bytes + interm_bytes
    vmem_limit = int(min(max(2 * vmem_need, 32 << 20), 64 << 20))

    kernel = _make_mlp_kernel(n_layers)

    out_full = pl.pallas_call(
        kernel,
        out_shape=jax.ShapeDtypeStruct((batch_p, out_p), jnp.float32),
        grid_spec=pltpu.PrefetchScalarGridSpec(
            num_scalar_prefetch=0,
            grid=grid,
            in_specs=[x_spec, d_spec] + w_specs,
            out_specs=out_spec,
        ),
        compiler_params=pltpu.CompilerParams(
            dimension_semantics=("parallel",),  # shards batch tiles on v7x 2xTC
            vmem_limit_bytes=vmem_limit,
        ),
        cost_estimate=pl.CostEstimate(
            flops=flops,
            transcendentals=transcendentals,
            bytes_accessed=bytes_accessed,
        ),
    )(x_p, d_p, *flat_params)

    param_f = out_full[:batch, :out_dim]
    mu_f = param_f[:, :n_z]
    # TODO(synk): training-mode reparameterization (z0 = eps*exp(0.5*logvar)+mu,
    # eps ~ N(0,1)) is a stochastic train-time path; eval mode returns z0 = mu_f.
    z0 = mu_f
    return z0, param_f


def init_params(layer_arch, key):
    """torch.nn.Linear default init: U[-1/sqrt(fan_in), 1/sqrt(fan_in)]."""
    params = []
    for i in range(len(layer_arch) - 1):
        fan_in, fan_out = layer_arch[i], layer_arch[i + 1]
        key, kw, kb = jax.random.split(key, 3)
        bound = 1.0 / math.sqrt(fan_in)
        w = jax.random.uniform(kw, (fan_in, fan_out), jnp.float32, -bound, bound)
        b = jax.random.uniform(kb, (fan_out,), jnp.float32, -bound, bound)
        params.append((w, b))
    return params


def _reference_forward(x0, d0, params):
    """Pure-JAX (f32) reference of the PyTorch module in eval mode."""
    h = jnp.concatenate((x0, d0), axis=1)
    n_layers = len(params)
    for i, (w, b) in enumerate(params):
        h = h @ w + b.reshape(1, -1)
        if i != n_layers - 1:
            h = jnp.tanh(h)
    param_f = h
    n_z = param_f.shape[1] // 2
    mu_f = param_f[:, :n_z]
    return mu_f, param_f


if __name__ == "__main__":
    # Small shapes consistent with VAEEncoder.forward: x0 [B, n_x], d0 [B, n_d],
    # layer_arch[0] == n_x + n_d, layer_arch[-1] == 2*n_z (mu, logvar).
    batch, n_x, n_d, hidden, n_z = 2, 16, 4, 32, 8
    layer_arch = [n_x + n_d, hidden, hidden, 2 * n_z]

    key = jax.random.PRNGKey(0)
    key, kx, kd, kp = jax.random.split(key, 4)
    x0 = jax.random.normal(kx, (batch, n_x), jnp.float32)
    d0 = jax.random.normal(kd, (batch, n_d), jnp.float32)
    params = init_params(layer_arch, kp)

    z0, param_f = vae_encoder_forward(x0, d0, params)
    z0 = jax.block_until_ready(z0)
    param_f = jax.block_until_ready(param_f)

    z_ref, p_ref = _reference_forward(x0, d0, params)
    assert z0.shape == (batch, n_z)
    assert param_f.shape == (batch, 2 * n_z)
    # bf16 weights on the MXU (f32 accumulate) -> compare at bf16-ish tolerance.
    assert jnp.allclose(param_f, p_ref, atol=3e-2, rtol=3e-2)
    assert jnp.allclose(z0, z_ref, atol=3e-2, rtol=3e-2)
    assert jnp.allclose(z0, param_f[:, :n_z])

    print("KERNEL_OK")
</pallas_src>

<mosaic_0001>
module attributes {stable_mosaic.version = 11 : i64} {
  func.func @kernel(%arg0: i32, %arg1: memref<8x128xf32, #tpu.memory_space<vmem>>, %arg2: memref<8x128xf32, #tpu.memory_space<vmem>>, %arg3: memref<128x128xbf16, #tpu.memory_space<vmem>>, %arg4: memref<128x128xbf16, #tpu.memory_space<vmem>>, %arg5: memref<1x128xf32, #tpu.memory_space<vmem>>, %arg6: memref<128x128xbf16, #tpu.memory_space<vmem>>, %arg7: memref<1x128xf32, #tpu.memory_space<vmem>>, %arg8: memref<128x128xbf16, #tpu.memory_space<vmem>>, %arg9: memref<1x128xf32, #tpu.memory_space<vmem>>, %arg10: memref<8x128xf32, #tpu.memory_space<vmem>>) attributes {dimension_semantics = [#tpu.dimension_semantics<parallel>], iteration_bounds = array<i64: 1>, scalar_prefetch = 0 : i64, scratch_operands = 0 : i64, tpu.core_type = #tpu.core_type<tc>, window_params = [{transform_indices = @transform_0, window_bounds = array<i64: 8, 128>}, {transform_indices = @transform_1, window_bounds = array<i64: 8, 128>}, {pipeline_mode = #tpu.pipeline_mode<synchronous>, transform_indices = @transform_2, window_bounds = array<i64: 128, 128>}, {pipeline_mode = #tpu.pipeline_mode<synchronous>, transform_indices = @transform_3, window_bounds = array<i64: 128, 128>}, {pipeline_mode = #tpu.pipeline_mode<synchronous>, transform_indices = @transform_4, window_bounds = array<i64: 1, 128>}, {pipeline_mode = #tpu.pipeline_mode<synchronous>, transform_indices = @transform_5, window_bounds = array<i64: 128, 128>}, {pipeline_mode = #tpu.pipeline_mode<synchronous>, transform_indices = @transform_6, window_bounds = array<i64: 1, 128>}, {pipeline_mode = #tpu.pipeline_mode<synchronous>, transform_indices = @transform_7, window_bounds = array<i64: 128, 128>}, {pipeline_mode = #tpu.pipeline_mode<synchronous>, transform_indices = @transform_8, window_bounds = array<i64: 1, 128>}, {transform_indices = @transform_9, window_bounds = array<i64: 8, 128>}]} {
    %c0 = arith.constant 0 : index
    %c0_0 = arith.constant 0 : index
    %0 = vector.load %arg1[%c0, %c0_0] : memref<8x128xf32, #tpu.memory_space<vmem>>, vector<8x128xf32>
    %1 = arith.truncf %0 : vector<8x128xf32> to vector<8x128xbf16>
    %c0_1 = arith.constant 0 : index
    %c0_2 = arith.constant 0 : index
    %2 = vector.load %arg3[%c0_1, %c0_2] : memref<128x128xbf16, #tpu.memory_space<vmem>>, vector<128x128xbf16>
    %cst = arith.constant dense<0.000000e+00> : vector<8x128xf32>
    %3 = tpu.matmul %1, %2, %cst {dimension_numbers = #tpu.dot_dimension_numbers<[1], [0], [0], [1], [0, 0, 1, 1], [], []>} : vector<8x128xbf16>, vector<128x128xbf16>, vector<8x128xf32> -> vector<8x128xf32>
    %c0_3 = arith.constant 0 : index
    %c0_4 = arith.constant 0 : index
    %4 = vector.load %arg2[%c0_3, %c0_4] : memref<8x128xf32, #tpu.memory_space<vmem>>, vector<8x128xf32>
    %5 = arith.truncf %4 : vector<8x128xf32> to vector<8x128xbf16>
    %c0_5 = arith.constant 0 : index
    %c0_6 = arith.constant 0 : index
    %6 = vector.load %arg4[%c0_5, %c0_6] : memref<128x128xbf16, #tpu.memory_space<vmem>>, vector<128x128xbf16>
    %cst_7 = arith.constant dense<0.000000e+00> : vector<8x128xf32>
    %7 = tpu.matmul %5, %6, %cst_7 {dimension_numbers = #tpu.dot_dimension_numbers<[1], [0], [0], [1], [0, 0, 1, 1], [], []>} : vector<8x128xbf16>, vector<128x128xbf16>, vector<8x128xf32> -> vector<8x128xf32>
    %8 = arith.addf %3, %7 : vector<8x128xf32>
    %c0_8 = arith.constant 0 : index
    %c0_9 = arith.constant 0 : index
    %9 = vector.load %arg5[%c0_8, %c0_9] : memref<1x128xf32, #tpu.memory_space<vmem>>, vector<1x128xf32>
    %10 = vector.broadcast %9 : vector<1x128xf32> to vector<8x128xf32>
    %11 = arith.addf %8, %10 : vector<8x128xf32>
    %12 = math.tanh %11 : vector<8x128xf32>
    %13 = arith.truncf %12 : vector<8x128xf32> to vector<8x128xbf16>
    %c0_10 = arith.constant 0 : index
    %c0_11 = arith.constant 0 : index
    %14 = vector.load %arg6[%c0_10, %c0_11] : memref<128x128xbf16, #tpu.memory_space<vmem>>, vector<128x128xbf16>
    %cst_12 = arith.constant dense<0.000000e+00> : vector<8x128xf32>
    %15 = tpu.matmul %13, %14, %cst_12 {dimension_numbers = #tpu.dot_dimension_numbers<[1], [0], [0], [1], [0, 0, 1, 1], [], []>} : vector<8x128xbf16>, vector<128x128xbf16>, vector<8x128xf32> -> vector<8x128xf32>
    %c0_13 = arith.constant 0 : index
    %c0_14 = arith.constant 0 : index
    %16 = vector.load %arg7[%c0_13, %c0_14] : memref<1x128xf32, #tpu.memory_space<vmem>>, vector<1x128xf32>
    %17 = vector.broadcast %16 : vector<1x128xf32> to vector<8x128xf32>
    %18 = arith.addf %15, %17 : vector<8x128xf32>
    %19 = math.tanh %18 : vector<8x128xf32>
    %20 = arith.truncf %19 : vector<8x128xf32> to vector<8x128xbf16>
    %c0_15 = arith.constant 0 : index
    %c0_16 = arith.constant 0 : index
    %21 = vector.load %arg8[%c0_15, %c0_16] : memref<128x128xbf16, #tpu.memory_space<vmem>>, vector<128x128xbf16>
    %cst_17 = arith.constant dense<0.000000e+00> : vector<8x128xf32>
    %22 = tpu.matmul %20, %21, %cst_17 {dimension_numbers = #tpu.dot_dimension_numbers<[1], [0], [0], [1], [0, 0, 1, 1], [], []>} : vector<8x128xbf16>, vector<128x128xbf16>, vector<8x128xf32> -> vector<8x128xf32>
    %c0_18 = arith.constant 0 : index
    %c0_19 = arith.constant 0 : index
    %23 = vector.load %arg9[%c0_18, %c0_19] : memref<1x128xf32, #tpu.memory_space<vmem>>, vector<1x128xf32>
    %24 = vector.broadcast %23 : vector<1x128xf32> to vector<8x128xf32>
    %25 = arith.addf %22, %24 : vector<8x128xf32>
    %c0_20 = arith.constant 0 : index
    %c0_21 = arith.constant 0 : index
    %26 = vector.load %arg10[%c0_20, %c0_21] : memref<8x128xf32, #tpu.memory_space<vmem>>, vector<8x128xf32>
    tpu.vector_store %arg10[%c0_20, %c0_21], %25 {strides = array<i32>} : memref<8x128xf32, #tpu.memory_space<vmem>>, vector<8x128xf32>,
    return
  }
  func.func @transform_0(%arg0: i32) -> (i32, i32) {
    %c0_i32 = arith.constant 0 : i32
    %c0_i32_0 = arith.constant 0 : i32
    return %arg0, %c0_i32 : i32, i32
  }
  func.func @transform_1(%arg0: i32) -> (i32, i32) {
    %c0_i32 = arith.constant 0 : i32
    %c0_i32_0 = arith.constant 0 : i32
    return %arg0, %c0_i32 : i32, i32
  }
  func.func @transform_2(%arg0: i32) -> (i32, i32) {
    %c0_i32 = arith.constant 0 : i32
    %c0_i32_0 = arith.constant 0 : i32
    %c0_i32_1 = arith.constant 0 : i32
    return %c0_i32, %c0_i32_0 : i32, i32
  }
  func.func @transform_3(%arg0: i32) -> (i32, i32) {
    %c0_i32 = arith.constant 0 : i32
    %c0_i32_0 = arith.constant 0 : i32
    %c0_i32_1 = arith.constant 0 : i32
    return %c0_i32, %c0_i32_0 : i32, i32
  }
  func.func @transform_4(%arg0: i32) -> (i32, i32) {
    %c0_i32 = arith.constant 0 : i32
    %c0_i32_0 = arith.constant 0 : i32
    %c0_i32_1 = arith.constant 0 : i32
    return %c0_i32, %c0_i32_0 : i32, i32
  }
  func.func @transform_5(%arg0: i32) -> (i32, i32) {
    %c0_i32 = arith.constant 0 : i32
    %c0_i32_0 = arith.constant 0 : i32
    %c0_i32_1 = arith.constant 0 : i32
    return %c0_i32, %c0_i32_0 : i32, i32
  }
  func.func @transform_6(%arg0: i32) -> (i32, i32) {
    %c0_i32 = arith.constant 0 : i32
    %c0_i32_0 = arith.constant 0 : i32
    %c0_i32_1 = arith.constant 0 : i32
    return %c0_i32, %c0_i32_0 : i32, i32
  }
  func.func @transform_7(%arg0: i32) -> (i32, i32) {
    %c0_i32 = arith.constant 0 : i32
    %c0_i32_0 = arith.constant 0 : i32
    %c0_i32_1 = arith.constant 0 : i32
    return %c0_i32, %c0_i32_0 : i32, i32
  }
  func.func @transform_8(%arg0: i32) -> (i32, i32) {
    %c0_i32 = arith.constant 0 : i32
    %c0_i32_0 = arith.constant 0 : i32
    %c0_i32_1 = arith.constant 0 : i32
    return %c0_i32, %c0_i32_0 : i32, i32
  }
  func.func @transform_9(%arg0: i32) -> (i32, i32) {
    %c0_i32 = arith.constant 0 : i32
    %c0_i32_0 = arith.constant 0 : i32
    return %arg0, %c0_i32 : i32, i32
  }
}

</mosaic_0001>

<bundles_post_ra>
// kernel: tpu_custom_call.1
= control target key start
LH: loop header
LB: loop body
LE: loop exit
PB: predicated region body
PF: predicated region fallthrough
CT: control target
= control target key end

     0   :  { %14 = vsyncpa [#allocation3], 0  ;;  %s1145_s0 = inlined_call_operand.hbm [shape: f32[8,128], index: 0, kind: input, shape index: {}]   ;;  %s1146_s1 = inlined_call_operand.hbm [shape: f32[8,128], index: 1, kind: input, shape index: {}]   ;;  %s1147_s2 = inlined_call_operand.hbm [shape: bf16[128,128], index: 2, kind: input, shape index: {}]   ;;  %s1148_s3 = inlined_call_operand.hbm [shape: bf16[128,128], index: 3, kind: input, shape index: {}]   ;;  %s1149_s4 = inlined_call_operand.vmem [shape: f32[1,128], index: 4, kind: input, shape index: {}]   ;;  %s1150_s5 = inlined_call_operand.hbm [shape: bf16[128,128], index: 5, kind: input, shape index: {}]   ;;  %s1151_s6 = inlined_call_operand.vmem [shape: f32[1,128], index: 6, kind: input, shape index: {}]   ;;  %s1152_s7 = inlined_call_operand.hbm [shape: bf16[128,128], index: 7, kind: input, shape index: {}]   ;;  %s1153_s8 = inlined_call_operand.vmem [shape: f32[1,128], index: 8, kind: input, shape index: {}]   ;;  %s1154_s9 = inlined_call_operand.hbm [shape: f32[8,128], index: 9, kind: output, shape index: {}]  }
   0x1   :  { %15 = vsyncpa [#allocation6], 0 }
   0x2   :  { %16 = vsyncpa [#allocation9], 0 }
   0x3   :  { %17 = vsyncpa [#allocation12], 0 }
   0x4   :  { %18 = vsyncpa [#allocation4], 0  ;;  %s939_s30 = smov [#allocation5]   ;;  %s775_s13 = scalar_lea.hbm %s1146_s1, 128 }
   0x5   :  { %s35_s10 = sshll.u32 %s939_s30, 4  ;;  %p776_p0 = scmp.ne.s32.totalorder %s1146_s1, %s775_s13  ;;  %s36_s10 = int_to_ptr.vmem [resolvable:$true] %s35_s10 }
   0x6   :  { %p779_p1 = scmp.lt.u32.totalorder %s775_s13, %s1146_s1 }
   0x8   :  { %p781_p2 = pnand %p779_p1, %p776_p0 }
   0xa   :  { %784 = shalt.err (!%p781_p2)
}
   0xb   :  { %s785_s18 = scalar_lea.vmem %s36_s10, 128  ;;  %p790_p4 = scmp.lt.s32.totalorder %s36_s10, %s36_s10 }
   0xc   :  { %p786_p3 = scmp.ne.s32.totalorder %s36_s10, %s785_s18  ;;  %p791_p5 = scmp.lt.s32.totalorder %s785_s18, %s785_s18 }
   0xe   :  { %p792_p6 = por %p791_p5, %p790_p4 }
  0x10   :  { %p793_p7 = pnand %p792_p6, %p786_p3 }
  0x12   :  { %796 = shalt.err (!%p793_p7)
}
  0x13   :  { %38 = dma.hbm_to_vmem [thread:$0]  %s1146_s1, 128, %s36_s10, [#allocation6]  }
  0x14   :  { %s940_s21 = smov [#allocation8]   ;;  %s941_s23 = smov [#allocation2]  }
  0x15   :  { %s56_s22 = sshll.u32 %s940_s21, 4  ;;  %s25_s24 = sshll.u32 %s941_s23, 4  ;;  %s57_s22 = int_to_ptr.vmem [resolvable:$true] %s56_s22  ;;  %s26_s24 = int_to_ptr.vmem [resolvable:$true] %s25_s24 }
  0x16   :  { %s797_s27 = scalar_lea.hbm %s1148_s3, 1024 }
  0x17   :  { %p798_p8 = scmp.ne.s32.totalorder %s1148_s3, %s797_s27  ;;  %p801_p9 = scmp.lt.u32.totalorder %s797_s27, %s1148_s3 }
  0x19   :  { %p803_p10 = pnand %p801_p9, %p798_p8 }
  0x1b   :  { %806 = shalt.err (!%p803_p10)
}
  0x1c   :  { %s807_s1 = scalar_lea.vmem %s57_s22, 1024  ;;  %p812_p12 = scmp.lt.s32.totalorder %s57_s22, %s57_s22 }
  0x1d   :  { %p808_p11 = scmp.ne.s32.totalorder %s57_s22, %s807_s1  ;;  %p813_p13 = scmp.lt.s32.totalorder %s807_s1, %s807_s1 }
  0x1f   :  { %p814_p0 = por %p813_p13, %p812_p12 }
  0x21   :  { %p815_p1 = pnand %p814_p0, %p808_p11 }
  0x23   :  { %818 = shalt.err (!%p815_p1)
}
  0x24   :  { %s942_s10 = smov 64   ;;  %s943_s12 = smov 4  }
  0x25   :  { %62 = dma.hbm_to_vmem [thread:$0]  %s1148_s3, 1024, %s57_s22, [#allocation9], %s942_s10, %s942_s10, %s943_s12  }
  0x26   :  { %s819_s17 = scalar_lea.hbm %s1145_s0, 128 }
  0x27   :  { %p820_p2 = scmp.ne.s32.totalorder %s1145_s0, %s819_s17  ;;  %p823_p3 = scmp.lt.u32.totalorder %s819_s17, %s1145_s0 }
  0x29   :  { %p825_p4 = pnand %p823_p3, %p820_p2 }
  0x2b   :  { %828 = shalt.err (!%p825_p4)
}
  0x2c   :  { %s829_s23 = scalar_lea.vmem %s26_s24, 128  ;;  %p834_p6 = scmp.lt.s32.totalorder %s26_s24, %s26_s24 }
  0x2d   :  { %p830_p5 = scmp.ne.s32.totalorder %s26_s24, %s829_s23  ;;  %p835_p7 = scmp.lt.s32.totalorder %s829_s23, %s829_s23 }
  0x2f   :  { %p836_p8 = por %p835_p7, %p834_p6 }
  0x31   :  { %p837_p9 = pnand %p836_p8, %p830_p5 }
  0x33   :  { %840 = shalt.err (!%p837_p9)
}
  0x34   :  { %28 = dma.hbm_to_vmem [thread:$0]  %s1145_s0, 128, %s26_s24, [#allocation3]  }
  0x35   :  { %s944_s25 = smov [#allocation7]   ;;  %s945_s27 = smov [#allocation10]  }
  0x36   :  { %s44_s26 = sshll.u32 %s944_s25, 4  ;;  %s70_s28 = sshll.u32 %s945_s27, 4  ;;  %s45_s26 = int_to_ptr.vmem [resolvable:$true] %s44_s26  ;;  %s71_s28 = int_to_ptr.vmem [resolvable:$true] %s70_s28 }
  0x37   :  { %s841_s11 = scalar_lea.hbm %s1147_s2, 1024 }
  0x38   :  { %p842_p10 = scmp.ne.s32.totalorder %s1147_s2, %s841_s11  ;;  %p845_p11 = scmp.lt.u32.totalorder %s841_s11, %s1147_s2 }
  0x3a   :  { %p847_p12 = pnand %p845_p11, %p842_p10 }
  0x3c   :  { %850 = shalt.err (!%p847_p12)
}
  0x3d   :  { %s851_s0 = scalar_lea.vmem %s45_s26, 1024  ;;  %p856_p0 = scmp.lt.s32.totalorder %s45_s26, %s45_s26 }
  0x3e   :  { %p852_p13 = scmp.ne.s32.totalorder %s45_s26, %s851_s0  ;;  %p857_p1 = scmp.lt.s32.totalorder %s851_s0, %s851_s0 }
  0x40   :  { %p858_p2 = por %p857_p1, %p856_p0 }
  0x42   :  { %p859_p3 = pnand %p858_p2, %p852_p13 }
  0x44   :  { %862 = shalt.err (!%p859_p3)
}
  0x45   :  { %50 = dma.hbm_to_vmem [thread:$0]  %s1147_s2, 1024, %s45_s26, [#allocation6], %s942_s10, %s942_s10, %s943_s12  }
  0x46   :  { %s863_s19 = scalar_lea.hbm %s1150_s5, 1024 }
  0x47   :  { %p864_p4 = scmp.ne.s32.totalorder %s1150_s5, %s863_s19  ;;  %p867_p5 = scmp.lt.u32.totalorder %s863_s19, %s1150_s5 }
  0x49   :  { %p869_p6 = pnand %p867_p5, %p864_p4 }
  0x4b   :  { %872 = shalt.err (!%p869_p6)
}
  0x4c   :  { %s873_s22 = scalar_lea.vmem %s71_s28, 1024  ;;  %p878_p8 = scmp.lt.s32.totalorder %s71_s28, %s71_s28 }
  0x4d   :  { %p874_p7 = scmp.ne.s32.totalorder %s71_s28, %s873_s22  ;;  %p879_p9 = scmp.lt.s32.totalorder %s873_s22, %s873_s22 }
  0x4f   :  { %p880_p10 = por %p879_p9, %p878_p8 }
  0x51   :  { %p881_p11 = pnand %p880_p10, %p874_p7 }
  0x53   :  { %884 = shalt.err (!%p881_p11)
}
  0x54   :  { %76 = dma.hbm_to_vmem [thread:$0]  %s1150_s5, 1024, %s71_s28, [#allocation9], %s942_s10, %s942_s10, %s943_s12  }
  0x55   :  { %s946_s26 = smov [#allocation11]   ;;  %s885_s11 = scalar_lea.hbm %s1152_s7, 1024 }
  0x56   :  { %s84_s27 = sshll.u32 %s946_s26, 4  ;;  %p886_p12 = scmp.ne.s32.totalorder %s1152_s7, %s885_s11  ;;  %s85_s27 = int_to_ptr.vmem [resolvable:$true] %s84_s27 }
  0x57   :  { %p889_p13 = scmp.lt.u32.totalorder %s885_s11, %s1152_s7 }
  0x59   :  { %p891_p0 = pnand %p889_p13, %p886_p12 }
  0x5b   :  { %894 = shalt.err (!%p891_p0)
}
  0x5c   :  { %s895_s0 = scalar_lea.vmem %s85_s27, 1024  ;;  %p900_p2 = scmp.lt.s32.totalorder %s85_s27, %s85_s27 }
  0x5d   :  { %p896_p1 = scmp.ne.s32.totalorder %s85_s27, %s895_s0  ;;  %p901_p3 = scmp.lt.s32.totalorder %s895_s0, %s895_s0 }
  0x5f   :  { %p902_p4 = por %p901_p3, %p900_p2 }
  0x61   :  { %p903_p5 = pnand %p902_p4, %p896_p1 }
  0x63   :  { %906 = shalt.err (!%p903_p5)
}
  0x64   :  { %90 = dma.hbm_to_vmem [thread:$0]  %s1152_s7, 1024, %s85_s27, [#allocation12], %s942_s10, %s942_s10, %s943_s12  }
  0x65   :  { %929 = dma.done.wait [#allocation3], 128  }
  0x66   :  { %930 = vsyncadd [#allocation3], 4294967168 }
  0x67   :  { %931 = dma.done.wait [#allocation6], 1152  }
  0x68   :  { %932 = vsyncadd [#allocation6], 4294966144 }
  0x69   :  { %933 = dma.done.wait [#allocation9], 2048  }
  0x6a   :  { %934 = vsyncadd [#allocation9], 4294965248 }
  0x6b   :  { %935 = dma.done.wait [#allocation12], 1024  }
  0x6c   :  { %936 = vsyncadd [#allocation12], 4294966272  ;;  %v947_v0 = vmov 0.0   ;;  %vm948_vm0 = vmmov 0   ;;  %v739_v1 = vld [vmem:[#allocation8] sm:$0xff]   ;;  %v741_v3 = vld [vmem:[#allocation8 + $0x8] sm:$0xff]  }
  0x6d   :  { %648 = vmatprep.subr.bf16.mxu0 %v947_v0  ;;  %668 = vmatprep.subr.bf16.mxu1 %v947_v0  ;;  %v740_v2 = vld [vmem:[#allocation7] sm:$0xff]   ;;  %v742_v4 = vld [vmem:[#allocation7 + $0x8] sm:$0xff]   ;;  %v743_v5 = vld [vmem:[#allocation8 + $0x10] sm:$0xff]   ;;  %s949_s17 = smov [#allocation13]  }
  0x6e   :  { %664 = vmatprep.mubr.msk.bf16.mxu0 %vm948_vm0, %v947_v0  ;;  %684 = vmatprep.mubr.msk.bf16.mxu1 %vm948_vm0, %v947_v0  ;;  %v744_v6 = vld [vmem:[#allocation7 + $0x10] sm:$0xff]   ;;  %v745_v7 = vld [vmem:[#allocation8 + $0x18] sm:$0xff]   ;;  %v747_v9 = vld [vmem:[#allocation8 + $0x20] sm:$0xff]   ;;  %s565_s18 = sshll.u32 %s949_s17, 4  ;;  %s566_s18 = int_to_ptr.vmem [resolvable:$true] %s565_s18 }
  0x6f   :  { %649 = vmatpush3.bf16.msra.mxu0 %v739_v1  ;;  %669 = vmatpush3.bf16.msra.mxu1 %v740_v2  ;;  %v746_v8 = vld [vmem:[#allocation7 + $0x18] sm:$0xff]   ;;  %v748_v10 = vld [vmem:[#allocation7 + $0x20] sm:$0xff]   ;;  %v749_v11 = vld [vmem:[#allocation8 + $0x28] sm:$0xff]   ;;  %p912_p7 = scmp.lt.s32.totalorder %s566_s18, %s566_s18 }
  0x70   :  { %650 = vmatprep.subr.bf16.mxu0 %v947_v0  ;;  %670 = vmatprep.subr.bf16.mxu1 %v947_v0  ;;  %v750_v12 = vld [vmem:[#allocation7 + $0x28] sm:$0xff]   ;;  %v751_v13 = vld [vmem:[#allocation8 + $0x30] sm:$0xff]   ;;  %v753_v15 = vld [vmem:[#allocation8 + $0x38] sm:$0xff]  }
  0x71   :  { %v752_v14 = vld [vmem:[#allocation7 + $0x30] sm:$0xff]   ;;  %v130_v16 = vld [vmem:[#allocation5] sm:$0xff]  ;;  %v755_v21 = vld [vmem:[#allocation10] sm:$0xff]  }
  0x72   :  { %v754_v17 = vld [vmem:[#allocation7 + $0x38] sm:$0xff]   ;;  %v112_v18 = vld [vmem:[#allocation2] sm:$0xff]  ;;  %v131_v19 = vpack.c.bf16 %v130_v16, %v130_v16  ;;  %v756_v22 = vld [vmem:[#allocation10 + $0x8] sm:$0xff]  }
  0x73   :  { %651 = vmatpush3.bf16.msra.mxu0 %v741_v3  ;;  %671 = vmatpush3.bf16.msra.mxu1 %v742_v4  ;;  %v113_v20 = vpack.c.bf16 %v112_v18, %v112_v18  ;;  %v757_v23 = vld [vmem:[#allocation10 + $0x10] sm:$0xff]   ;;  %v758_v24 = vld [vmem:[#allocation10 + $0x18] sm:$0xff]   ;;  %v759_v25 = vld [vmem:[#allocation10 + $0x20] sm:$0xff]  }
  0x74   :  { %652 = vmatprep.subr.bf16.mxu0 %v947_v0  ;;  %672 = vmatprep.subr.bf16.mxu1 %v947_v0  ;;  %v760_v26 = vld [vmem:[#allocation10 + $0x28] sm:$0xff]   ;;  %v761_v27 = vld [vmem:[#allocation10 + $0x30] sm:$0xff]   ;;  %v762_v28 = vld [vmem:[#allocation10 + $0x38] sm:$0xff]  }
  0x75   :  { %v763_v29 = vld [vmem:[#allocation11] sm:$0xff]   ;;  %v764_v30 = vld [vmem:[#allocation11 + $0x8] sm:$0xff]   ;;  %v765_v31 = vld [vmem:[#allocation11 + $0x10] sm:$0xff]  }
  0x76   :  { %v766_v32 = vld [vmem:[#allocation11 + $0x18] sm:$0xff]   ;;  %v593_v35 = vld [vmem:[%s1149_s4] ss:$0 sm:$0xff]  ;;  %v767_v46 = vld [vmem:[#allocation11 + $0x20] sm:$0xff]  }
  0x77   :  { %653 = vmatpush3.bf16.msra.mxu0 %v743_v5  ;;  %673 = vmatpush3.bf16.msra.mxu1 %v744_v6  ;;  %v768_v47 = vld [vmem:[#allocation11 + $0x28] sm:$0xff]   ;;  %v769_v48 = vld [vmem:[#allocation11 + $0x30] sm:$0xff]   ;;  %v770_v49 = vld [vmem:[#allocation11 + $0x38] sm:$0xff]  }
  0x78   :  { %654 = vmatprep.subr.bf16.mxu0 %v947_v0  ;;  %674 = vmatprep.subr.bf16.mxu1 %v947_v0  ;;  %v594_v50 = vld [vmem:[%s1151_s6] ss:$0 sm:$0xff]  ;;  %s907_s6 = scalar_lea.vmem %s566_s18, 128 }
  0x79   :  { %v603_v58 = vld [vmem:[%s1153_s8] ss:$0 sm:$0xff]  ;;  %p908_p6 = scmp.ne.s32.totalorder %s566_s18, %s907_s6  ;;  %p913_p8 = scmp.lt.s32.totalorder %s907_s6, %s907_s6 }
  0x7b   :  { %655 = vmatpush3.bf16.msra.mxu0 %v745_v7  ;;  %675 = vmatpush3.bf16.msra.mxu1 %v746_v8  ;;  %p914_p9 = por %p913_p8, %p912_p7 }
  0x7c   :  { %656 = vmatprep.subr.bf16.mxu0 %v947_v0  ;;  %676 = vmatprep.subr.bf16.mxu1 %v947_v0 }
  0x7d   :  { %p915_p10 = pnand %p914_p9, %p908_p6 }
  0x7f   :  { %657 = vmatpush3.bf16.msra.mxu0 %v747_v9  ;;  %677 = vmatpush3.bf16.msra.mxu1 %v748_v10 }
  0x80   :  { %658 = vmatprep.subr.bf16.mxu0 %v947_v0  ;;  %678 = vmatprep.subr.bf16.mxu1 %v947_v0 }
  0x83   :  { %659 = vmatpush3.bf16.msra.mxu0 %v749_v11  ;;  %679 = vmatpush3.bf16.msra.mxu1 %v750_v12 }
  0x84   :  { %660 = vmatprep.subr.bf16.mxu0 %v947_v0  ;;  %680 = vmatprep.subr.bf16.mxu1 %v947_v0 }
  0x87   :  { %661 = vmatpush3.bf16.msra.mxu0 %v751_v13  ;;  %681 = vmatpush3.bf16.msra.mxu1 %v752_v14 }
  0x88   :  { %662 = vmatprep.subr.bf16.mxu0 %v947_v0  ;;  %682 = vmatprep.subr.bf16.mxu1 %v947_v0 }
  0x8b   :  { %663 = vmatpush3.bf16.msra.mxu0 %v753_v15  ;;  %683 = vmatpush3.bf16.msra.mxu1 %v754_v17 }
  0x8c   :  { %688 = vmatprep.subr.bf16.mxu0 %v947_v0  ;;  %708 = vmatprep.subr.bf16.mxu1 %v947_v0 }
  0x8e   :  { %665 = vmatmul.mubr.bf16.vlgmr.msra.gmra.mrb[0].mxu0 %v131_v19  ;;  %685 = vmatmul.mubr.bf16.vlgmr.msra.gmra.mrb[0].mxu1 %v113_v20 }
  0x8f   :  { %689 = vmatpush3.bf16.msra.mxu0 %v755_v21  ;;  %704 = vmatprep.mubr.msk.bf16.mxu0 %vm948_vm0, %v947_v0 }
  0x90   :  { %690 = vmatprep.subr.bf16.mxu0 %v947_v0  ;;  %724 = vmatprep.mubr.msk.bf16.mxu1 %vm948_vm0, %v947_v0 }
  0x91   :  { %709 = vmatpush3.bf16.msra.mxu1 %v763_v29 }
  0x92   :  { %710 = vmatprep.subr.bf16.mxu1 %v947_v0 }
  0x93   :  { %691 = vmatpush3.bf16.msra.mxu0 %v756_v22 }
  0x94   :  { %692 = vmatprep.subr.bf16.mxu0 %v947_v0 }
  0x95   :  { %711 = vmatpush3.bf16.msra.mxu1 %v764_v30 }
  0x96   :  { %712 = vmatprep.subr.bf16.mxu1 %v947_v0 }
  0x97   :  { %693 = vmatpush3.bf16.msra.mxu0 %v757_v23 }
  0x98   :  { %694 = vmatprep.subr.bf16.mxu0 %v947_v0 }
  0x99   :  { %713 = vmatpush3.bf16.msra.mxu1 %v765_v31 }
  0x9a   :  { %714 = vmatprep.subr.bf16.mxu1 %v947_v0 }
  0x9b   :  { %695 = vmatpush3.bf16.msra.mxu0 %v758_v24 }
  0x9c   :  { %696 = vmatprep.subr.bf16.mxu0 %v947_v0 }
  0x9d   :  { %715 = vmatpush3.bf16.msra.mxu1 %v766_v32 }
  0x9e   :  { %716 = vmatprep.subr.bf16.mxu1 %v947_v0 }
  0x9f   :  { %697 = vmatpush3.bf16.msra.mxu0 %v759_v25 }
  0xa0   :  { %698 = vmatprep.subr.bf16.mxu0 %v947_v0 }
  0xa1   :  { %717 = vmatpush3.bf16.msra.mxu1 %v767_v46 }
  0xa2   :  { %718 = vmatprep.subr.bf16.mxu1 %v947_v0 }
  0xa3   :  { %699 = vmatpush3.bf16.msra.mxu0 %v760_v26 }
  0xa4   :  { %700 = vmatprep.subr.bf16.mxu0 %v947_v0 }
  0xa5   :  { %719 = vmatpush3.bf16.msra.mxu1 %v768_v47 }
  0xa6   :  { %720 = vmatprep.subr.bf16.mxu1 %v947_v0 }
  0xa7   :  { %701 = vmatpush3.bf16.msra.mxu0 %v761_v27 }
  0xa8   :  { %702 = vmatprep.subr.bf16.mxu0 %v947_v0 }
  0xa9   :  { %721 = vmatpush3.bf16.msra.mxu1 %v769_v48 }
  0xaa   :  { %722 = vmatprep.subr.bf16.mxu1 %v947_v0 }
  0xab   :  { %703 = vmatpush3.bf16.msra.mxu0 %v762_v28 }
  0xad   :  { %723 = vmatpush3.bf16.msra.mxu1 %v770_v49 }
 0x161   :  { %v230_v33 = vpop.f32.mrb[0].mxu0  ;;  %v318_v34 = vpop.f32.mrb[0].mxu1 }
 0x162   :  { %v666_v36 = vpop.f32.mrb[1].mxu0  ;;  %v319_v37 = vadd.f32 %v318_v34, %v230_v33  ;;  %v686_v38 = vpop.f32.mrb[1].mxu1 }
 0x163   :  { %v233_v39 = vpop.f32.mrb[2].mxu0  ;;  %v321_v40 = vpop.f32.mrb[2].mxu1 }
 0x164   :  { %v667_v41 = vpop.f32.mrb[3].mxu0  ;;  %v331_v42 = vadd.f32 %v593_v35, %v319_v37  ;;  %v687_v43 = vpop.f32.mrb[3].mxu1 }
 0x166   :  { %771 = vtanh.f32 %v331_v42 }
 0x170   :  { %v772_v44 = vpop.eup %771 }
 0x171   :  { %v333_v45 = vpack.c.bf16 %v772_v44, %v772_v44 }
 0x173   :  { %705 = vmatmul.mubr.bf16.vlgmr.msra.gmra.mrb[4].mxu0 %v333_v45 }
 0x246   :  { %v439_v51 = vpop.f32.mrb[4].mxu0 }
 0x247   :  { %v440_v52 = vadd.f32 %v594_v50, %v439_v51  ;;  %v706_v53 = vpop.f32.mrb[5].mxu0 }
 0x248   :  { %v442_v54 = vpop.f32.mrb[6].mxu0 }
 0x249   :  { %773 = vtanh.f32 %v440_v52  ;;  %v707_v55 = vpop.f32.mrb[7].mxu0 }
 0x253   :  { %v774_v56 = vpop.eup %773 }
 0x254   :  { %v446_v57 = vpack.c.bf16 %v774_v56, %v774_v56 }
 0x256   :  { %725 = vmatmul.mubr.bf16.vlgmr.msra.gmra.mrb[4].mxu1 %v446_v57 }
 0x329   :  { %v552_v59 = vpop.f32.mrb[4].mxu1 }
 0x32a   :  { %v553_v60 = vadd.f32 %v603_v58, %v552_v59  ;;  %v726_v61 = vpop.f32.mrb[5].mxu1 }
 0x32b   :  { %v555_v62 = vpop.f32.mrb[6].mxu1 }
 0x32c   :  { %558 = vst [vmem:[#allocation13] sm:$0xff] %v553_v60  ;;  %v727_v63 = vpop.f32.mrb[7].mxu1 }
 0x32d   :  { %918 = shalt.err (!%p915_p10)
}
 0x32e   :  { %s919_s8 = scalar_lea.hbm %s1154_s9, 128 }
 0x32f   :  { %p920_p11 = scmp.ne.s32.totalorder %s1154_s9, %s919_s8  ;;  %p923_p12 = scmp.lt.u32.totalorder %s919_s8, %s1154_s9 }
 0x331   :  { %p925_p13 = pnand %p923_p12, %p920_p11 }
 0x333   :  { %928 = shalt.err (!%p925_p13)
}
 0x334   :  { %568 = dma.vmem_to_hbm [thread:$0]  %s566_s18, 128, %s1154_s9, [#allocation4]  }
 0x335   :  { %937 = dma.done.wait [#allocation4], 128  }
 0x336   :  { %938 = vsyncadd [#allocation4], 4294967168 }
 0x337   :  { %572 = vsyncpa [#allocation3], 1 }
 0x338   :  { %573 = vsyncpa [#allocation6], 1 }
 0x339   :  { %574 = vsyncpa [#allocation9], 1 }
 0x33a   :  { %575 = vsyncpa [#allocation12], 1 }
 0x33b   :  { %576 = vsyncpa [#allocation4], 1 }

</bundles_post_ra>
